<compile_context>
chip_gen: v7x
topology: tpu7x:2x2x1
jax: 0.10.0
libtpu: 0.0.40
codegen_flags: <defaults>
</compile_context>

<pallas_src>
import functools
import numpy as np
import jax
import jax.numpy as jnp
from jax.experimental import pallas as pl
from jax.experimental.pallas import tpu as pltpu


_VMEM_LIMIT = 48 * 1024 * 1024     # raised scoped-VMEM limit (v5e default is 16 MiB; <=48 MiB is safe on v7x)
_RESIDENT_SINGLE_BUFFER = True     # pl.Buffered(1) on constant-index (resident) weight blocks


def _round_up(x, m):
    return ((x + m - 1) // m) * m


def _pad_to(a, shape):
    pads = [(0, s - d) for d, s in zip(a.shape, shape)]
    if any(p[1] for p in pads):
        a = jnp.pad(a, pads)
    return a


def _resident_spec(block_shape, index_map):
    """BlockSpec for a VMEM-resident operand (constant index map).

    Single-buffered (pl.Buffered(1)): the block index never changes, so the default
    double buffer only wastes VMEM (important for big W_hh on v7x's 64 MiB VMEM).
    Only applied to constant-index operands; operands whose block index changes keep
    the default double buffer for DMA/compute overlap.
    """
    if _RESIDENT_SINGLE_BUFFER:
        return pl.BlockSpec(block_shape, index_map, pipeline_mode=pl.Buffered(1))
    return pl.BlockSpec(block_shape, index_map)


# ----------------------------------------------------------------------------
# Generic tiled matmul + bias:  y = x @ w + b
#   used for (a) the hoisted layer-0 input projection and (b) the tied decoder linear.
#   x/w bf16 on the MXU, accumulation/bias-add f32.
# ----------------------------------------------------------------------------
def _mm_kernel_single_k(x_ref, w_ref, b_ref, o_ref):
    # Single K block: no accumulator scratch, no pl.when init/finalize machinery.
    o_ref[...] = (jnp.dot(x_ref[...], w_ref[...], preferred_element_type=jnp.float32)
                  + b_ref[...]).astype(o_ref.dtype)


def _mm_kernel_acc(x_ref, w_ref, b_ref, o_ref, acc_ref):
    @pl.when(pl.program_id(2) == 0)
    def _():
        acc_ref[...] = jnp.zeros_like(acc_ref)

    acc_ref[...] += jnp.dot(x_ref[...], w_ref[...], preferred_element_type=jnp.float32)

    @pl.when(pl.program_id(2) == pl.num_programs(2) - 1)
    def _():
        # bias added only on the last k step -> never double-added on padded k blocks
        o_ref[...] = (acc_ref[...] + b_ref[...]).astype(o_ref.dtype)


def matmul_bias(x, w, b, *, tm=256, tn=512, tk=512, out_dtype=jnp.float32, out_cols=None):
    """x: (M, Kx), w: (Kw, N), b: (N,)|(1, N) -> (M, out_cols or N) = x @ w + b.

    w/b may be pre-padded + pre-cast (bf16) so no per-forward cast/pad pass is done on them.
    """
    M, Kx = x.shape
    Kw, N = w.shape
    K = max(Kx, Kw)
    tm = min(tm, _round_up(M, 8))
    tn = min(tn, _round_up(N, 128))
    tk = min(tk, _round_up(K, 128))
    Mp, Np, Kp = _round_up(M, tm), _round_up(N, tn), _round_up(K, tk)

    xp = _pad_to(x, (Mp, Kp))
    if xp.dtype != jnp.bfloat16:
        xp = xp.astype(jnp.bfloat16)
    wp = _pad_to(w, (Kp, Np))
    if wp.dtype != jnp.bfloat16:
        wp = wp.astype(jnp.bfloat16)
    if b.ndim == 1:
        b = b.reshape(1, -1)
    bp = _pad_to(b.astype(jnp.float32), (1, Np))

    if Kp == tk:
        out = pl.pallas_call(
            _mm_kernel_single_k,
            out_shape=jax.ShapeDtypeStruct((Mp, Np), out_dtype),
            grid_spec=pltpu.PrefetchScalarGridSpec(
                num_scalar_prefetch=0,
                grid=(Mp // tm, Np // tn),
                in_specs=[
                    pl.BlockSpec((tm, Kp), lambda i, j: (i, 0)),
                    pl.BlockSpec((Kp, tn), lambda i, j: (0, j)),
                    pl.BlockSpec((1, tn), lambda i, j: (0, j)),
                ],
                out_specs=pl.BlockSpec((tm, tn), lambda i, j: (i, j)),
            ),
            compiler_params=pltpu.CompilerParams(
                dimension_semantics=("parallel", "parallel"),
                vmem_limit_bytes=_VMEM_LIMIT),
        )(xp, wp, bp)
    else:
        out = pl.pallas_call(
            _mm_kernel_acc,
            out_shape=jax.ShapeDtypeStruct((Mp, Np), out_dtype),
            grid_spec=pltpu.PrefetchScalarGridSpec(
                num_scalar_prefetch=0,
                grid=(Mp // tm, Np // tn, Kp // tk),
                in_specs=[
                    pl.BlockSpec((tm, tk), lambda i, j, k: (i, k)),
                    pl.BlockSpec((tk, tn), lambda i, j, k: (k, j)),
                    pl.BlockSpec((1, tn), lambda i, j, k: (0, j)),
                ],
                out_specs=pl.BlockSpec((tm, tn), lambda i, j, k: (i, j)),
                scratch_shapes=[pltpu.VMEM((tm, tn), jnp.float32)],
            ),
            compiler_params=pltpu.CompilerParams(
                dimension_semantics=("parallel", "parallel", "arbitrary"),
                vmem_limit_bytes=_VMEM_LIMIT),
        )(xp, wp, bp)

    ncols = N if out_cols is None else out_cols
    return out[:M, :ncols]


# ----------------------------------------------------------------------------
# Fused multi-layer LSTM recurrence ("wavefront"): per timestep, run every layer's cell
# back-to-back.  Layer 0's input gates come precomputed (bf16 stream); layers >=1 compute
# x @ W_ih in-kernel from the layer below's fresh h.  PyTorch gate order: i, f, g, o, each
# gate padded to a 128-lane block.  Only the LAST layer's h is written out (f32).
# ----------------------------------------------------------------------------
def _fused_lstm_kernel(*refs, nlayers, h_pads, unroll):
    n_in = 2 + 3 * (nlayers - 1)
    in_refs = refs[:n_in]
    y_ref = refs[n_in]
    scr = refs[n_in + 1:]

    gx_ref = in_refs[0]
    whh = [in_refs[1]]
    wih = [None]
    bias = [None]
    p = 2
    for _ in range(1, nlayers):
        wih.append(in_refs[p])
        bias.append(in_refs[p + 1])
        whh.append(in_refs[p + 2])
        p += 3
    h_scr = [scr[2 * l] for l in range(nlayers)]
    c_scr = [scr[2 * l + 1] for l in range(nlayers)]

    @pl.when(pl.program_id(1) == 0)
    def _():
        # init_hidden() in the reference module is zeros -> no h0/c0 input DMAs needed.
        for l in range(nlayers):
            h_scr[l][...] = jnp.zeros_like(h_scr[l])
            c_scr[l][...] = jnp.zeros_like(c_scr[l])

    def cell(gates, c, hp):
        # hp is a multiple of 128 -> each slice is a lane-aligned, unmasked view.
        i_g = jax.nn.sigmoid(gates[:, 0:hp])
        f_g = jax.nn.sigmoid(gates[:, hp:2 * hp])
        g_g = jnp.tanh(gates[:, 2 * hp:3 * hp])
        o_g = jax.nn.sigmoid(gates[:, 3 * hp:4 * hp])
        c_new = f_g * c + i_g * g_g
        h_new = o_g * jnp.tanh(c_new)
        return h_new, c_new

    def step(t, carry):
        # layer 0: precomputed bf16 input gates + recurrent matmul
        gates = gx_ref[t].astype(jnp.float32) + jnp.dot(
            h_scr[0][...].astype(jnp.bfloat16), whh[0][...],
            preferred_element_type=jnp.float32)
        h_new, c_new = cell(gates, c_scr[0][...], h_pads[0])
        h_scr[0][...] = h_new
        c_scr[0][...] = c_new
        x = h_new
        # layers 1..L-1: input projection from the fresh h below + recurrent matmul
        for l in range(1, nlayers):
            gates = (bias[l][...]
                     + jnp.dot(x.astype(jnp.bfloat16), wih[l][...],
                               preferred_element_type=jnp.float32)
                     + jnp.dot(h_scr[l][...].astype(jnp.bfloat16), whh[l][...],
                               preferred_element_type=jnp.float32))
            h_new, c_new = cell(gates, c_scr[l][...], h_pads[l])
            h_scr[l][...] = h_new
            c_scr[l][...] = c_new
            x = h_new
        y_ref[t] = x          # final layer kept f32 (raw_output interface)
        return carry

    jax.lax.fori_loop(0, gx_ref.shape[0], step, 0, unroll=unroll)


def fused_lstm(gates_x0, layers, h_pads, *, time_chunk=32):
    """gates_x0: (T, Bp, 4*H0p) bf16; layers[l]: padded bf16 weights; -> (T, Bp, H_last) f32."""
    T, Bp, G0 = gates_x0.shape
    nlayers = len(layers)
    H_last = h_pads[-1]

    TC = min(time_chunk, T)
    Tp = _round_up(T, TC)
    gx = _pad_to(gates_x0, (Tp, Bp, G0))     # padded trailing timesteps are sliced off below

    # Batch-block "parallel" axis: on v7x each TensorCore runs an independent recurrence
    # (own h/c scratch) when the padded batch splits into two 8-aligned blocks.
    n_bb = 2 if (Bp >= 16 and Bp % 16 == 0) else 1
    BB = Bp // n_bb

    # Small fixed unroll decoupled from TC: full unroll overflows the 64-vreg file at big H.
    unroll = max(1, min(4, 2048 // max(1, 4 * max(h_pads) * nlayers)))

    kernel = functools.partial(_fused_lstm_kernel, nlayers=nlayers,
                               h_pads=tuple(h_pads), unroll=unroll)

    in_arrays = [gx, layers[0]["whh_p"]]
    # TODO(synk): if profiling shows the gates DMA exposed at small H/TC, bump the gates
    # BlockSpec to pipeline_mode=pl.Buffered(3).
    in_specs = [
        pl.BlockSpec((TC, BB, G0), lambda b, t: (t, b, 0)),
        _resident_spec((h_pads[0], 4 * h_pads[0]), lambda b, t: (0, 0)),
    ]
    for l in range(1, nlayers):
        in_arrays += [layers[l]["wih_p"], layers[l]["bias_p"], layers[l]["whh_p"]]
        in_specs += [
            _resident_spec((h_pads[l - 1], 4 * h_pads[l]), lambda b, t: (0, 0)),
            _resident_spec((1, 4 * h_pads[l]), lambda b, t: (0, 0)),
            _resident_spec((h_pads[l], 4 * h_pads[l]), lambda b, t: (0, 0)),
        ]

    scratch = []
    for l in range(nlayers):
        scratch += [pltpu.VMEM((BB, h_pads[l]), jnp.float32),   # h_l
                    pltpu.VMEM((BB, h_pads[l]), jnp.float32)]   # c_l

    y = pl.pallas_call(
        kernel,
        out_shape=jax.ShapeDtypeStruct((Tp, Bp, H_last), jnp.float32),
        grid_spec=pltpu.PrefetchScalarGridSpec(
            num_scalar_prefetch=0,
            grid=(n_bb, Tp // TC),
            in_specs=in_specs,
            out_specs=pl.BlockSpec((TC, BB, H_last), lambda b, t: (t, b, 0)),
            scratch_shapes=scratch,
        ),
        compiler_params=pltpu.CompilerParams(
            dimension_semantics=("parallel", "arbitrary"),
            vmem_limit_bytes=_VMEM_LIMIT),
    )(*in_arrays)
    return y[:T]


# ----------------------------------------------------------------------------
# Parameters: f32 init -> bf16 master weights (biases stay f32); one-time prep pads
# weights into the 128-lane gate-block layout consumed by the kernels.
# ----------------------------------------------------------------------------
def init_params(key, vocsize, embsize, hiddensize, nlayers):
    initrange = 1.0 / np.sqrt(embsize)
    keys = jax.random.split(key, 2 + 4 * nlayers)
    enc_w = jax.random.uniform(keys[0], (vocsize, embsize), jnp.float32,
                               -initrange, initrange).astype(jnp.bfloat16)
    dec_b = jax.random.uniform(keys[1], (vocsize,), jnp.float32, -initrange, initrange)
    rnns = []
    for l in range(nlayers):
        insz = embsize if l == 0 else hiddensize
        outsz = embsize if l == nlayers - 1 else hiddensize
        stdv = 1.0 / np.sqrt(outsz)
        k = keys[2 + 4 * l: 2 + 4 * (l + 1)]
        # stored pre-transposed (contraction dim leading) and bf16 -> no per-forward work
        w_ih_t = jax.random.uniform(k[0], (insz, 4 * outsz), jnp.float32,
                                    -stdv, stdv).astype(jnp.bfloat16)
        w_hh_t = jax.random.uniform(k[1], (outsz, 4 * outsz), jnp.float32,
                                    -stdv, stdv).astype(jnp.bfloat16)
        b_ih = jax.random.uniform(k[2], (4 * outsz,), jnp.float32, -stdv, stdv)
        b_hh = jax.random.uniform(k[3], (4 * outsz,), jnp.float32, -stdv, stdv)
        rnns.append(dict(w_ih_t=w_ih_t, w_hh_t=w_hh_t, bias=b_ih + b_hh,
                         in_size=insz, out_size=outsz))
    # tied decoder (no_tied=False path): decoder weight = encoder weight
    return dict(encoder=enc_w, decoder_bias=dec_b, rnns=rnns)


def _gate_pad_cols(w2d, out_size, out_pad):
    """(rows, 4*out_size) -> (rows, 4*out_pad): gate g (i,f,g,o) placed at col g*out_pad."""
    if out_size == out_pad:
        return w2d
    rows = w2d.shape[0]
    out = jnp.zeros((rows, 4 * out_pad), w2d.dtype)
    for g in range(4):
        out = out.at[:, g * out_pad: g * out_pad + out_size].set(
            w2d[:, g * out_size: (g + 1) * out_size])
    return out


def prepare_rnnlm(params):
    """One-time pad/cast of all weights (bf16, 128-lane gate blocks, matmul-tile padding)."""
    enc = params["encoder"]                       # (V, E) bf16
    vocsize, embsize = enc.shape
    layers, h_pads = [], []
    for l, lay in enumerate(params["rnns"]):
        insz, outsz = lay["in_size"], lay["out_size"]
        hp = _round_up(outsz, 128)
        h_pads.append(hp)
        whh_p = _pad_to(_gate_pad_cols(lay["w_hh_t"], outsz, hp), (hp, 4 * hp))
        wih_g = _gate_pad_cols(lay["w_ih_t"], outsz, hp)               # (insz, 4*hp) bf16
        bias_g = _gate_pad_cols(lay["bias"].reshape(1, -1), outsz, hp)  # (1, 4*hp) f32
        entry = dict(whh_p=whh_p)
        if l == 0:
            # consumed by the hoisted projection (matmul_bias): pre-pad K to its tile
            tk = min(512, _round_up(insz, 128))
            entry["wih0_p"] = _pad_to(wih_g, (_round_up(insz, tk), 4 * hp))
            entry["bias0_p"] = bias_g
        else:
            entry["wih_p"] = _pad_to(wih_g, (h_pads[l - 1], 4 * hp))
            entry["bias_p"] = bias_g
        layers.append(entry)
    # tied decoder weight = encoder^T, pre-padded to the decoder matmul's tiles
    dec_w_t = enc.T                               # (E, V) bf16
    tn = min(512, _round_up(vocsize, 128))
    tk = min(512, _round_up(embsize, 128))
    dec_w_p = _pad_to(dec_w_t, (_round_up(embsize, tk), _round_up(vocsize, tn)))
    dec_b_p = _pad_to(params["decoder_bias"].astype(jnp.float32).reshape(1, -1),
                      (1, _round_up(vocsize, tn)))
    return dict(encoder=enc, layers=layers, h_pads=h_pads,
                dec_w_p=dec_w_p, dec_b_p=dec_b_p,
                vocsize=vocsize, embsize=embsize)


# ----------------------------------------------------------------------------
# Forward
# ----------------------------------------------------------------------------
def _pack_indices(T, B, lens):
    """Time-major pack_padded_sequence row indices (lens sorted descending)."""
    lens = np.asarray(lens)
    idx = []
    for t in range(T):
        bs = int(np.sum(lens > t))
        idx.extend(t * B + b for b in range(bs))
    return np.asarray(idx, dtype=np.int32)


def rnnlm_forward(model, inputs, sents_len_np, *, time_chunk=32):
    """inputs: (T, B) int32. Returns (packed model_output f32, raw_output f32)."""
    T, B = inputs.shape
    E = model["embsize"]
    Bp = _round_up(B, 8)                          # sublane-align the batch

    # TODO(synk): embedding lookup and pack_padded selection are plain-JAX gathers
    # (jnp.take) -- no clean Pallas gather equivalent for these glue ops.
    emb = jnp.take(model["encoder"], inputs, axis=0)            # (T, B, E) bf16
    emb = _pad_to(emb, (T, Bp, E))                # padded batch lanes compute garbage, sliced off below

    # Hoisted cuDNN-style layer-0 input projection: one big MXU matmul, bf16 gates stream.
    lay0 = model["layers"][0]
    G0 = lay0["whh_p"].shape[1]                   # 4 * H0 (padded)
    gates_x0 = matmul_bias(emb.reshape(T * Bp, E), lay0["wih0_p"], lay0["bias0_p"],
                           out_dtype=jnp.bfloat16)
    gates_x0 = gates_x0.reshape(T, Bp, G0)

    # Fused multi-layer recurrence: inter-layer activations never hit HBM.
    y = fused_lstm(gates_x0, model["layers"], model["h_pads"], time_chunk=time_chunk)
    raw_output = y[:, :B, :E]                                    # (T, B, E) f32

    # pack_padded selection BEFORE the decoder matmul: logits only for valid positions.
    pack_idx = jnp.asarray(_pack_indices(T, B, sents_len_np))
    packed_h = jnp.take(raw_output.reshape(T * B, E), pack_idx, axis=0)
    # tm=1024 -> the (E x V) tied decoder weight streams from HBM once for typical sum(lens).
    packed = matmul_bias(packed_h, model["dec_w_p"], model["dec_b_p"],
                         tm=1024, out_cols=model["vocsize"])     # (sum(lens), V) f32
    return packed, raw_output


# ----------------------------------------------------------------------------
# Pure-JAX f32 reference (same bf16-valued weights, f32 math) for correctness check
# ----------------------------------------------------------------------------
def _ref_lstm_layer(x, w_ih_t, w_hh_t, bias, h0, c0):
    H = h0.shape[-1]

    def step(carry, xt):
        h, c = carry
        gates = xt @ w_ih_t + h @ w_hh_t + bias
        i = jax.nn.sigmoid(gates[:, 0:H])
        f = jax.nn.sigmoid(gates[:, H:2 * H])
        g = jnp.tanh(gates[:, 2 * H:3 * H])
        o = jax.nn.sigmoid(gates[:, 3 * H:4 * H])
        c = f * c + i * g
        h = o * jnp.tanh(c)
        return (h, c), h

    _, ys = jax.lax.scan(step, (h0, c0), x)
    return ys


def _ref_forward(params, inputs):
    T, B = inputs.shape
    enc_f32 = params["encoder"].astype(jnp.float32)
    out = jnp.take(enc_f32, inputs, axis=0)
    for lay in params["rnns"]:
        H = lay["out_size"]
        out = _ref_lstm_layer(out, lay["w_ih_t"].astype(jnp.float32),
                              lay["w_hh_t"].astype(jnp.float32), lay["bias"],
                              jnp.zeros((B, H)), jnp.zeros((B, H)))
    logits = out @ enc_f32.T + params["decoder_bias"]
    return logits, out


if __name__ == "__main__":
    # small config consistent with the module
    VOC, EMB, HID, NLAYERS = 128, 32, 32, 2
    T, B = 8, 2
    sents_len = np.array([8, 5], dtype=np.int32)   # sorted descending

    key = jax.random.PRNGKey(0)
    pkey, dkey = jax.random.split(key)
    params = init_params(pkey, VOC, EMB, HID, NLAYERS)
    model = prepare_rnnlm(params)
    inputs = jax.random.randint(dkey, (T, B), 0, VOC, dtype=jnp.int32)

    try:
        packed, raw = rnnlm_forward(model, inputs, sents_len)
    except Exception:
        # Portability fallback: if this Pallas build rejects pipeline_mode=pl.Buffered(1)
        # on the top-level pipeline, retry with default double-buffered resident weights.
        _RESIDENT_SINGLE_BUFFER = False
        packed, raw = rnnlm_forward(model, inputs, sents_len)
    packed = jax.block_until_ready(packed)
    raw = jax.block_until_ready(raw)

    # correctness check against a pure-JAX f32 reference (bf16 MXU/gates -> looser tol)
    ref_logits, ref_raw = _ref_forward(params, inputs)
    pack_idx = jnp.asarray(_pack_indices(T, B, sents_len))
    ref_packed = jnp.take(ref_logits.reshape(T * B, VOC), pack_idx, axis=0)

    assert packed.shape == (int(sents_len.sum()), VOC)
    assert raw.shape == (T, B, EMB)
    np.testing.assert_allclose(np.asarray(raw), np.asarray(ref_raw),
                               rtol=3e-2, atol=2e-2)
    np.testing.assert_allclose(np.asarray(packed), np.asarray(ref_packed),
                               rtol=3e-2, atol=2e-2)

    print("KERNEL_OK")
</pallas_src>

<mosaic_0001>
module attributes {stable_mosaic.version = 11 : i64} {
  func.func @_mm_kernel_single_k(%arg0: i32, %arg1: i32, %arg2: memref<64x128xbf16, #tpu.memory_space<vmem>>, %arg3: memref<128x512xbf16, #tpu.memory_space<vmem>>, %arg4: memref<1x512xf32, #tpu.memory_space<vmem>>, %arg5: memref<64x512xbf16, #tpu.memory_space<vmem>>) attributes {dimension_semantics = [#tpu.dimension_semantics<parallel>, #tpu.dimension_semantics<parallel>], iteration_bounds = array<i64: 1, 1>, scalar_prefetch = 0 : i64, scratch_operands = 0 : i64, tpu.core_type = #tpu.core_type<tc>, window_params = [{transform_indices = @transform_0, window_bounds = array<i64: 64, 128>}, {transform_indices = @transform_1, window_bounds = array<i64: 128, 512>}, {transform_indices = @transform_2, window_bounds = array<i64: 1, 512>}, {transform_indices = @transform_3, window_bounds = array<i64: 64, 512>}]} {
    %c0 = arith.constant 0 : index
    %c0_0 = arith.constant 0 : index
    %0 = vector.load %arg2[%c0, %c0_0] : memref<64x128xbf16, #tpu.memory_space<vmem>>, vector<64x128xbf16>
    %c0_1 = arith.constant 0 : index
    %c0_2 = arith.constant 0 : index
    %1 = vector.load %arg3[%c0_1, %c0_2] : memref<128x512xbf16, #tpu.memory_space<vmem>>, vector<128x512xbf16>
    %cst = arith.constant dense<0.000000e+00> : vector<64x512xf32>
    %2 = tpu.matmul %0, %1, %cst {dimension_numbers = #tpu.dot_dimension_numbers<[1], [0], [0], [1], [0, 0, 1, 1], [], []>} : vector<64x128xbf16>, vector<128x512xbf16>, vector<64x512xf32> -> vector<64x512xf32>
    %c0_3 = arith.constant 0 : index
    %c0_4 = arith.constant 0 : index
    %3 = vector.load %arg4[%c0_3, %c0_4] : memref<1x512xf32, #tpu.memory_space<vmem>>, vector<1x512xf32>
    %4 = vector.broadcast %3 : vector<1x512xf32> to vector<64x512xf32>
    %5 = arith.addf %2, %4 : vector<64x512xf32>
    %6 = arith.truncf %5 : vector<64x512xf32> to vector<64x512xbf16>
    %c0_5 = arith.constant 0 : index
    %c0_6 = arith.constant 0 : index
    %7 = vector.load %arg5[%c0_5, %c0_6] : memref<64x512xbf16, #tpu.memory_space<vmem>>, vector<64x512xbf16>
    tpu.vector_store %arg5[%c0_5, %c0_6], %6 {strides = array<i32>} : memref<64x512xbf16, #tpu.memory_space<vmem>>, vector<64x512xbf16>,
    return
  }
  func.func @transform_0(%arg0: i32, %arg1: i32) -> (i32, i32) {
    %c0_i32 = arith.constant 0 : i32
    %c0_i32_0 = arith.constant 0 : i32
    return %arg0, %c0_i32 : i32, i32
  }
  func.func @transform_1(%arg0: i32, %arg1: i32) -> (i32, i32) {
    %c0_i32 = arith.constant 0 : i32
    %c0_i32_0 = arith.constant 0 : i32
    return %c0_i32, %arg1 : i32, i32
  }
  func.func @transform_2(%arg0: i32, %arg1: i32) -> (i32, i32) {
    %c0_i32 = arith.constant 0 : i32
    %c0_i32_0 = arith.constant 0 : i32
    return %c0_i32, %arg1 : i32, i32
  }
  func.func @transform_3(%arg0: i32, %arg1: i32) -> (i32, i32) {
    %c0_i32 = arith.constant 0 : i32
    return %arg0, %arg1 : i32, i32
  }
}

module attributes {stable_mosaic.version = 11 : i64} {
  func.func @_mm_kernel_single_k(%arg0: i32, %arg1: i32, %arg2: memref<64x128xbf16, #tpu.memory_space<vmem>>, %arg3: memref<128x512xbf16, #tpu.memory_space<vmem>>, %arg4: memref<1x512xf32, #tpu.memory_space<vmem>>, %arg5: memref<64x512xbf16, #tpu.memory_space<vmem>>) attributes {dimension_semantics = [#tpu.dimension_semantics<parallel>, #tpu.dimension_semantics<parallel>], iteration_bounds = array<i64: 1, 1>, scalar_prefetch = 0 : i64, scratch_operands = 0 : i64, tpu.core_type = #tpu.core_type<tc>, window_params = [{transform_indices = @transform_0, window_bounds = array<i64: 64, 128>}, {transform_indices = @transform_1, window_bounds = array<i64: 128, 512>}, {transform_indices = @transform_2, window_bounds = array<i64: 1, 512>}, {transform_indices = @transform_3, window_bounds = array<i64: 64, 512>}]} {
    %c0 = arith.constant 0 : index
    %c0_0 = arith.constant 0 : index
    %0 = vector.load %arg2[%c0, %c0_0] : memref<64x128xbf16, #tpu.memory_space<vmem>>, vector<64x128xbf16>
    %c0_1 = arith.constant 0 : index
    %c0_2 = arith.constant 0 : index
    %1 = vector.load %arg3[%c0_1, %c0_2] : memref<128x512xbf16, #tpu.memory_space<vmem>>, vector<128x512xbf16>
    %cst = arith.constant dense<0.000000e+00> : vector<64x512xf32>
    %2 = tpu.matmul %0, %1, %cst {dimension_numbers = #tpu.dot_dimension_numbers<[1], [0], [0], [1], [0, 0, 1, 1], [], []>} : vector<64x128xbf16>, vector<128x512xbf16>, vector<64x512xf32> -> vector<64x512xf32>
    %c0_3 = arith.constant 0 : index
    %c0_4 = arith.constant 0 : index
    %3 = vector.load %arg4[%c0_3, %c0_4] : memref<1x512xf32, #tpu.memory_space<vmem>>, vector<1x512xf32>
    %4 = vector.broadcast %3 : vector<1x512xf32> to vector<64x512xf32>
    %5 = arith.addf %2, %4 : vector<64x512xf32>
    %6 = arith.truncf %5 : vector<64x512xf32> to vector<64x512xbf16>
    %c0_5 = arith.constant 0 : index
    %c0_6 = arith.constant 0 : index
    %7 = vector.load %arg5[%c0_5, %c0_6] : memref<64x512xbf16, #tpu.memory_space<vmem>>, vector<64x512xbf16>
    tpu.vector_store %arg5[%c0_5, %c0_6], %6 {strides = array<i32>} : memref<64x512xbf16, #tpu.memory_space<vmem>>, vector<64x512xbf16>,
    return
  }
  func.func @transform_0(%arg0: i32, %arg1: i32) -> (i32, i32) {
    %c0_i32 = arith.constant 0 : i32
    %c0_i32_0 = arith.constant 0 : i32
    return %arg0, %c0_i32 : i32, i32
  }
  func.func @transform_1(%arg0: i32, %arg1: i32) -> (i32, i32) {
    %c0_i32 = arith.constant 0 : i32
    %c0_i32_0 = arith.constant 0 : i32
    return %c0_i32, %arg1 : i32, i32
  }
  func.func @transform_2(%arg0: i32, %arg1: i32) -> (i32, i32) {
    %c0_i32 = arith.constant 0 : i32
    %c0_i32_0 = arith.constant 0 : i32
    return %c0_i32, %arg1 : i32, i32
  }
  func.func @transform_3(%arg0: i32, %arg1: i32) -> (i32, i32) {
    %c0_i32 = arith.constant 0 : i32
    return %arg0, %arg1 : i32, i32
  }
}

</mosaic_0001>

<bundles_post_ra>
// kernel: tpu_custom_call.1
= control target key start
LH: loop header
LB: loop body
LE: loop exit
PB: predicated region body
PF: predicated region fallthrough
CT: control target
= control target key end

     0   :  { %8 = vsyncpa [#allocation3], 0  ;;  %s887_s0 = inlined_call_operand.hbm [shape: bf16[64,128], index: 0, kind: input, shape index: {}]   ;;  %s888_s1 = inlined_call_operand.hbm [shape: bf16[128,512], index: 1, kind: input, shape index: {}]   ;;  %s889_s2 = inlined_call_operand.vmem [shape: f32[1,512], index: 2, kind: input, shape index: {}]   ;;  %s890_s3 = inlined_call_operand.hbm [shape: bf16[64,512], index: 3, kind: output, shape index: {}]  }
   0x1   :  { %9 = vsyncpa [#allocation6], 0 }
   0x2   :  { %10 = vsyncpa [#allocation4], 0  ;;  %s766_s12 = smov [#allocation2]   ;;  %s694_s16 = scalar_lea.hbm %s887_s0, 512 }
   0x3   :  { %s16_s13 = sshll.u32 %s766_s12, 4  ;;  %p695_p0 = scmp.ne.s32.totalorder %s887_s0, %s694_s16  ;;  %s17_s13 = int_to_ptr.vmem [resolvable:$true] %s16_s13 }
   0x4   :  { %p698_p1 = scmp.lt.u32.totalorder %s694_s16, %s887_s0 }
   0x6   :  { %p700_p2 = pnand %p698_p1, %p695_p0 }
   0x8   :  { %703 = shalt.err (!%p700_p2)
}
   0x9   :  { %s704_s21 = scalar_lea.vmem %s17_s13, 512  ;;  %p709_p4 = scmp.lt.s32.totalorder %s17_s13, %s17_s13 }
   0xa   :  { %p705_p3 = scmp.ne.s32.totalorder %s17_s13, %s704_s21  ;;  %p710_p5 = scmp.lt.s32.totalorder %s704_s21, %s704_s21 }
   0xc   :  { %p711_p6 = por %p710_p5, %p709_p4 }
   0xe   :  { %p712_p7 = pnand %p711_p6, %p705_p3 }
  0x10   :  { %715 = shalt.err (!%p712_p7)
}
  0x11   :  { %s767_s22 = smov 64   ;;  %s768_s23 = smov 4  }
  0x12   :  { %22 = dma.hbm_to_vmem [thread:$0]  %s887_s0, 512, %s17_s13, [#allocation3], %s767_s22, %s767_s22, %s768_s23  }
  0x13   :  { %s769_s26 = smov [#allocation5]   ;;  %s716_s30 = scalar_lea.hbm %s888_s1, 4096 }
  0x14   :  { %s28_s27 = sshll.u32 %s769_s26, 4  ;;  %p717_p8 = scmp.ne.s32.totalorder %s888_s1, %s716_s30  ;;  %s29_s27 = int_to_ptr.vmem [resolvable:$true] %s28_s27 }
  0x15   :  { %p720_p9 = scmp.lt.u32.totalorder %s716_s30, %s888_s1 }
  0x17   :  { %p722_p10 = pnand %p720_p9, %p717_p8 }
  0x19   :  { %725 = shalt.err (!%p722_p10)
}
  0x1a   :  { %s726_s8 = scalar_lea.vmem %s29_s27, 4096  ;;  %p731_p12 = scmp.lt.s32.totalorder %s29_s27, %s29_s27 }
  0x1b   :  { %p727_p11 = scmp.ne.s32.totalorder %s29_s27, %s726_s8  ;;  %p732_p13 = scmp.lt.s32.totalorder %s726_s8, %s726_s8 }
  0x1d   :  { %p733_p0 = por %p732_p13, %p731_p12 }
  0x1f   :  { %p734_p1 = pnand %p733_p0, %p727_p11 }
  0x21   :  { %737 = shalt.err (!%p734_p1)
}
  0x22   :  { %s770_s0 = smov 256   ;;  %s771_s9 = smov 16  }
  0x23   :  { %34 = dma.hbm_to_vmem [thread:$0]  %s888_s1, 4096, %s29_s27, [#allocation6], %s770_s0, %s770_s0, %s771_s9  }
  0x24   :  { %760 = dma.done.wait [#allocation3], 512  }
  0x25   :  { %761 = vsyncadd [#allocation3], 4294966784 }
  0x26   :  { %762 = dma.done.wait [#allocation6], 4096  }
  0x27   :  { %763 = vsyncadd [#allocation6], 4294963200  ;;  %v772_v0 = vmov 0   ;;  %v642_v1 = vld [vmem:[#allocation5 + $0x4] ss:$16 sps:$4 sm:$0xff]   ;;  %v691_v34 = vld [vmem:[#allocation2 + $0x8] sm:$0xff]   ;;  %v86_v37 = vlaneseq }
  0x28   :  { %322 = vmatprep.mubr.bf16.mxu0 %v772_v0  ;;  %395 = vmatprep.mubr.bf16.mxu1 %v772_v0  ;;  %v644_v2 = vld [vmem:[#allocation5 + $0xc] ss:$16 sps:$4 sm:$0xff]   ;;  %v646_v3 = vld [vmem:[#allocation5] ss:$16 sps:$4 sm:$0xff]   ;;  %v647_v4 = vld [vmem:[#allocation5 + $0x8] ss:$16 sps:$4 sm:$0xff]  }
  0x29   :  { %290 = vmatprep.subr.bf16.mxu0 %v642_v1  ;;  %363 = vmatprep.subr.bf16.mxu1 %v644_v2  ;;  %v648_v5 = vld [vmem:[#allocation5 + $0x24] ss:$16 sps:$4 sm:$0xff]   ;;  %v650_v6 = vld [vmem:[#allocation5 + $0x2c] ss:$16 sps:$4 sm:$0xff]   ;;  %v652_v7 = vld [vmem:[#allocation5 + $0x20] ss:$16 sps:$4 sm:$0xff]  }
  0x2a   :  { %291 = vmatpush1.bf16.msra.mxu0 %v646_v3  ;;  %364 = vmatpush1.bf16.msra.mxu1 %v647_v4  ;;  %v653_v8 = vld [vmem:[#allocation5 + $0x28] ss:$16 sps:$4 sm:$0xff]   ;;  %v654_v9 = vld [vmem:[#allocation5 + $0x44] ss:$16 sps:$4 sm:$0xff]   ;;  %v656_v10 = vld [vmem:[#allocation5 + $0x4c] ss:$16 sps:$4 sm:$0xff]  }
  0x2b   :  { %292 = vmatprep.subr.bf16.mxu0 %v648_v5  ;;  %365 = vmatprep.subr.bf16.mxu1 %v650_v6  ;;  %v658_v11 = vld [vmem:[#allocation5 + $0x40] ss:$16 sps:$4 sm:$0xff]   ;;  %v659_v12 = vld [vmem:[#allocation5 + $0x48] ss:$16 sps:$4 sm:$0xff]   ;;  %v660_v13 = vld [vmem:[#allocation5 + $0x64] ss:$16 sps:$4 sm:$0xff]  }
  0x2c   :  { %v662_v14 = vld [vmem:[#allocation5 + $0x6c] ss:$16 sps:$4 sm:$0xff]   ;;  %v664_v15 = vld [vmem:[#allocation5 + $0x60] ss:$16 sps:$4 sm:$0xff]   ;;  %v665_v16 = vld [vmem:[#allocation5 + $0x68] ss:$16 sps:$4 sm:$0xff]  }
  0x2d   :  { %v666_v17 = vld [vmem:[#allocation5 + $0x84] ss:$16 sps:$4 sm:$0xff]   ;;  %v668_v18 = vld [vmem:[#allocation5 + $0x8c] ss:$16 sps:$4 sm:$0xff]   ;;  %v670_v19 = vld [vmem:[#allocation5 + $0x80] ss:$16 sps:$4 sm:$0xff]  }
  0x2e   :  { %293 = vmatpush1.bf16.msra.mxu0 %v652_v7  ;;  %366 = vmatpush1.bf16.msra.mxu1 %v653_v8  ;;  %v671_v20 = vld [vmem:[#allocation5 + $0x88] ss:$16 sps:$4 sm:$0xff]   ;;  %v672_v21 = vld [vmem:[#allocation5 + $0xa4] ss:$16 sps:$4 sm:$0xff]   ;;  %v674_v22 = vld [vmem:[#allocation5 + $0xac] ss:$16 sps:$4 sm:$0xff]  }
  0x2f   :  { %294 = vmatprep.subr.bf16.mxu0 %v654_v9  ;;  %367 = vmatprep.subr.bf16.mxu1 %v656_v10  ;;  %v676_v23 = vld [vmem:[#allocation5 + $0xa0] ss:$16 sps:$4 sm:$0xff]   ;;  %v677_v24 = vld [vmem:[#allocation5 + $0xa8] ss:$16 sps:$4 sm:$0xff]   ;;  %v678_v25 = vld [vmem:[#allocation5 + $0xc4] ss:$16 sps:$4 sm:$0xff]  }
  0x30   :  { %v680_v26 = vld [vmem:[#allocation5 + $0xcc] ss:$16 sps:$4 sm:$0xff]   ;;  %v682_v27 = vld [vmem:[#allocation5 + $0xc0] ss:$16 sps:$4 sm:$0xff]   ;;  %v683_v28 = vld [vmem:[#allocation5 + $0xc8] ss:$16 sps:$4 sm:$0xff]  }
  0x31   :  { %v684_v29 = vld [vmem:[#allocation5 + $0xe4] ss:$16 sps:$4 sm:$0xff]   ;;  %v686_v30 = vld [vmem:[#allocation5 + $0xec] ss:$16 sps:$4 sm:$0xff]   ;;  %v688_v31 = vld [vmem:[#allocation5 + $0xe0] ss:$16 sps:$4 sm:$0xff]  }
  0x32   :  { %295 = vmatpush1.bf16.msra.mxu0 %v658_v11  ;;  %368 = vmatpush1.bf16.msra.mxu1 %v659_v12  ;;  %v689_v32 = vld [vmem:[#allocation5 + $0xe8] ss:$16 sps:$4 sm:$0xff]   ;;  %v690_v33 = vld [vmem:[#allocation2] sm:$0xff]   ;;  %v692_v35 = vld [vmem:[#allocation2 + $0x10] sm:$0xff]   ;;  %v87_v38 = vshrl.u32 %v86_v37, 7 }
  0x33   :  { %296 = vmatprep.subr.bf16.mxu0 %v660_v13  ;;  %369 = vmatprep.subr.bf16.mxu1 %v662_v14  ;;  %v693_v36 = vld [vmem:[#allocation2 + $0x18] sm:$0xff]   ;;  %v84_v41 = vld [vmem:[%s889_s2] sm:$0xf]  ;;  %s773_s2 = smov [#allocation7]  }
  0x34   :  { %v88_v39 = vsub.s32 0, %v87_v38  ;;  %v96_v40 = vsub.s32 2, %v87_v38  ;;  %v92_v42 = vsub.s32 1, %v87_v38  ;;  %v100_v43 = vsub.s32 3, %v87_v38  ;;  %s553_s13 = sshll.u32 %s773_s2, 4  ;;  %s554_s13 = int_to_ptr.vmem [resolvable:$true] %s553_s13 }
  0x35   :  { %s738_s14 = scalar_lea.vmem %s554_s13, 2048  ;;  %p743_p3 = scmp.lt.s32.totalorder %s554_s13, %s554_s13 }
  0x36   :  { %297 = vmatpush1.bf16.msra.mxu0 %v664_v15  ;;  %370 = vmatpush1.bf16.msra.mxu1 %v665_v16  ;;  %v832_v44 = vrot.slane %v84_v41, %v88_v39  ;;  %v834_v45 = vrot.slane %v84_v41, %v96_v40  ;;  %v836_v46 = vrot.slane %v84_v41, %v92_v42  ;;  %p739_p2 = scmp.ne.s32.totalorder %s554_s13, %s738_s14  ;;  %p744_p4 = scmp.lt.s32.totalorder %s738_s14, %s738_s14 }
  0x37   :  { %298 = vmatprep.subr.bf16.mxu0 %v666_v17  ;;  %371 = vmatprep.subr.bf16.mxu1 %v668_v18  ;;  %v838_v47 = vrot.slane %v84_v41, %v100_v43 }
  0x38   :  { %p745_p5 = por %p744_p4, %p743_p3 }
  0x3a   :  { %299 = vmatpush1.bf16.msra.mxu0 %v670_v19  ;;  %372 = vmatpush1.bf16.msra.mxu1 %v671_v20  ;;  %p746_p6 = pnand %p745_p5, %p739_p2 }
  0x3b   :  { %300 = vmatprep.subr.bf16.mxu0 %v672_v21  ;;  %373 = vmatprep.subr.bf16.mxu1 %v674_v22 }
  0x3e   :  { %301 = vmatpush1.bf16.msra.mxu0 %v676_v23  ;;  %374 = vmatpush1.bf16.msra.mxu1 %v677_v24 }
  0x3f   :  { %302 = vmatprep.subr.bf16.mxu0 %v678_v25  ;;  %375 = vmatprep.subr.bf16.mxu1 %v680_v26 }
  0x42   :  { %303 = vmatpush1.bf16.msra.mxu0 %v682_v27  ;;  %376 = vmatpush1.bf16.msra.mxu1 %v683_v28 }
  0x43   :  { %304 = vmatprep.subr.bf16.mxu0 %v684_v29  ;;  %377 = vmatprep.subr.bf16.mxu1 %v686_v30 }
  0x46   :  { %305 = vmatpush1.bf16.msra.mxu0 %v688_v31  ;;  %378 = vmatpush1.bf16.msra.mxu1 %v689_v32 }
  0x49   :  { %323 = vmatmul.mubr.bf16.vlgmr.msra.gmra.mrb[0].mxu0 %v690_v33  ;;  %396 = vmatmul.mubr.bf16.vlgmr.msra.gmra.mrb[0].mxu1 %v690_v33 }
  0x4a   :  { %332 = vmatprep.mubr.bf16.mxu0 %v772_v0  ;;  %405 = vmatprep.mubr.bf16.mxu1 %v772_v0 }
  0x51   :  { %333 = vmatmul.mubr.bf16.gmra.mrb[4].mxu0 %v691_v34  ;;  %406 = vmatmul.mubr.bf16.gmra.mrb[4].mxu1 %v691_v34 }
  0x52   :  { %342 = vmatprep.mubr.bf16.mxu0 %v772_v0  ;;  %415 = vmatprep.mubr.bf16.mxu1 %v772_v0 }
  0x59   :  { %343 = vmatmul.mubr.bf16.gmra.mrb[8].mxu0 %v692_v35  ;;  %416 = vmatmul.mubr.bf16.gmra.mrb[8].mxu1 %v692_v35 }
  0x5a   :  { %352 = vmatprep.mubr.bf16.mxu0 %v772_v0  ;;  %425 = vmatprep.mubr.bf16.mxu1 %v772_v0 }
  0x61   :  { %353 = vmatmul.mubr.bf16.gmra.mrb[12].mxu0 %v693_v36  ;;  %426 = vmatmul.mubr.bf16.gmra.mrb[12].mxu1 %v693_v36 }
 0x11c   :  { %v324_v48 = vpop.f32.mrb[0].mxu0  ;;  %v397_v49 = vpop.f32.mrb[0].mxu1 }
 0x11d   :  { %v325_v50 = vadd.f32 %v324_v48, %v832_v44  ;;  %v398_v51 = vadd.f32 %v397_v49, %v834_v45  ;;  %v326_v52 = vpop.f32.mrb[1].mxu0  ;;  %v399_v53 = vpop.f32.mrb[1].mxu1 }
 0x11e   :  { %v327_v54 = vadd.f32 %v326_v52, %v836_v46  ;;  %v400_v55 = vadd.f32 %v399_v53, %v838_v47  ;;  %v328_v56 = vpop.f32.mrb[2].mxu0  ;;  %v401_v57 = vpop.f32.mrb[2].mxu1 }
 0x11f   :  { %v329_v58 = vadd.f32 %v328_v56, %v832_v44  ;;  %v402_v59 = vadd.f32 %v401_v57, %v834_v45  ;;  %v330_v60 = vpop.f32.mrb[3].mxu0  ;;  %v403_v61 = vpop.f32.mrb[3].mxu1 }
 0x120   :  { %v618_v62 = vpack.c.bf16 %v327_v54, %v325_v50  ;;  %v619_v63 = vpack.c.bf16 %v400_v55, %v398_v51  ;;  %v331_v0 = vadd.f32 %v330_v60, %v836_v46  ;;  %v404_v1 = vadd.f32 %v403_v61, %v838_v47 }
 0x122   :  { %532 = vst [vmem:[#allocation7] sm:$0xff] %v618_v62  ;;  %533 = vst [vmem:[#allocation7 + $0x8] sm:$0xff] %v619_v63  ;;  %v620_v2 = vpack.c.bf16 %v331_v0, %v329_v58  ;;  %v621_v3 = vpack.c.bf16 %v404_v1, %v402_v59 }
 0x124   :  { %534 = vst [vmem:[#allocation7 + $0x10] sm:$0xff] %v620_v2  ;;  %535 = vst [vmem:[#allocation7 + $0x18] sm:$0xff] %v621_v3  ;;  %v334_v4 = vpop.f32.mrb[4].mxu0  ;;  %v407_v5 = vpop.f32.mrb[4].mxu1 }
 0x125   :  { %v335_v6 = vadd.f32 %v334_v4, %v832_v44  ;;  %v408_v7 = vadd.f32 %v407_v5, %v834_v45  ;;  %v336_v8 = vpop.f32.mrb[5].mxu0  ;;  %v409_v9 = vpop.f32.mrb[5].mxu1 }
 0x126   :  { %v337_v10 = vadd.f32 %v336_v8, %v836_v46  ;;  %v410_v11 = vadd.f32 %v409_v9, %v838_v47  ;;  %v338_v12 = vpop.f32.mrb[6].mxu0  ;;  %v411_v13 = vpop.f32.mrb[6].mxu1 }
 0x127   :  { %v339_v14 = vadd.f32 %v338_v12, %v832_v44  ;;  %v412_v15 = vadd.f32 %v411_v13, %v834_v45  ;;  %v340_v16 = vpop.f32.mrb[7].mxu0  ;;  %v413_v17 = vpop.f32.mrb[7].mxu1 }
 0x128   :  { %v622_v18 = vpack.c.bf16 %v337_v10, %v335_v6  ;;  %v623_v19 = vpack.c.bf16 %v410_v11, %v408_v7  ;;  %v341_v20 = vadd.f32 %v340_v16, %v836_v46  ;;  %v414_v21 = vadd.f32 %v413_v17, %v838_v47 }
 0x12a   :  { %536 = vst [vmem:[#allocation7 + $0x20] sm:$0xff] %v622_v18  ;;  %537 = vst [vmem:[#allocation7 + $0x28] sm:$0xff] %v623_v19  ;;  %v624_v22 = vpack.c.bf16 %v341_v20, %v339_v14  ;;  %v625_v23 = vpack.c.bf16 %v414_v21, %v412_v15 }
 0x12c   :  { %538 = vst [vmem:[#allocation7 + $0x30] sm:$0xff] %v624_v22  ;;  %539 = vst [vmem:[#allocation7 + $0x38] sm:$0xff] %v625_v23  ;;  %v344_v24 = vpop.f32.mrb[8].mxu0  ;;  %v417_v25 = vpop.f32.mrb[8].mxu1 }
 0x12d   :  { %v345_v26 = vadd.f32 %v344_v24, %v832_v44  ;;  %v418_v27 = vadd.f32 %v417_v25, %v834_v45  ;;  %v346_v28 = vpop.f32.mrb[9].mxu0  ;;  %v419_v29 = vpop.f32.mrb[9].mxu1 }
 0x12e   :  { %v347_v30 = vadd.f32 %v346_v28, %v836_v46  ;;  %v420_v31 = vadd.f32 %v419_v29, %v838_v47  ;;  %v348_v32 = vpop.f32.mrb[10].mxu0  ;;  %v421_v33 = vpop.f32.mrb[10].mxu1 }
 0x12f   :  { %v349_v34 = vadd.f32 %v348_v32, %v832_v44  ;;  %v422_v35 = vadd.f32 %v421_v33, %v834_v45  ;;  %v350_v36 = vpop.f32.mrb[11].mxu0  ;;  %v423_v37 = vpop.f32.mrb[11].mxu1 }
 0x130   :  { %v626_v38 = vpack.c.bf16 %v347_v30, %v345_v26  ;;  %v627_v39 = vpack.c.bf16 %v420_v31, %v418_v27  ;;  %v351_v40 = vadd.f32 %v350_v36, %v836_v46  ;;  %v424_v41 = vadd.f32 %v423_v37, %v838_v47 }
 0x132   :  { %540 = vst [vmem:[#allocation7 + $0x40] sm:$0xff] %v626_v38  ;;  %541 = vst [vmem:[#allocation7 + $0x48] sm:$0xff] %v627_v39  ;;  %v628_v42 = vpack.c.bf16 %v351_v40, %v349_v34  ;;  %v629_v43 = vpack.c.bf16 %v424_v41, %v422_v35 }
 0x134   :  { %542 = vst [vmem:[#allocation7 + $0x50] sm:$0xff] %v628_v42  ;;  %543 = vst [vmem:[#allocation7 + $0x58] sm:$0xff] %v629_v43  ;;  %v354_v48 = vpop.f32.mrb[12].mxu0  ;;  %v427_v49 = vpop.f32.mrb[12].mxu1 }
 0x135   :  { %v355_v50 = vadd.f32 %v354_v48, %v832_v44  ;;  %v428_v51 = vadd.f32 %v427_v49, %v834_v45  ;;  %v356_v52 = vpop.f32.mrb[13].mxu0  ;;  %v429_v53 = vpop.f32.mrb[13].mxu1 }
 0x136   :  { %v357_v54 = vadd.f32 %v356_v52, %v836_v46  ;;  %v430_v55 = vadd.f32 %v429_v53, %v838_v47  ;;  %v358_v56 = vpop.f32.mrb[14].mxu0  ;;  %v431_v57 = vpop.f32.mrb[14].mxu1 }
 0x137   :  { %v359_v58 = vadd.f32 %v358_v56, %v832_v44  ;;  %v432_v59 = vadd.f32 %v431_v57, %v834_v45  ;;  %v360_v60 = vpop.f32.mrb[15].mxu0  ;;  %v433_v61 = vpop.f32.mrb[15].mxu1 }
 0x138   :  { %v630_v62 = vpack.c.bf16 %v357_v54, %v355_v50  ;;  %v631_v63 = vpack.c.bf16 %v430_v55, %v428_v51  ;;  %v361_v0 = vadd.f32 %v360_v60, %v836_v46  ;;  %v434_v1 = vadd.f32 %v433_v61, %v838_v47 }
 0x13a   :  { %544 = vst [vmem:[#allocation7 + $0x60] sm:$0xff] %v630_v62  ;;  %545 = vst [vmem:[#allocation7 + $0x68] sm:$0xff] %v631_v63  ;;  %v632_v2 = vpack.c.bf16 %v361_v0, %v359_v58  ;;  %v633_v3 = vpack.c.bf16 %v434_v1, %v432_v59 }
 0x13c   :  { %546 = vst [vmem:[#allocation7 + $0x70] sm:$0xff] %v632_v2  ;;  %547 = vst [vmem:[#allocation7 + $0x78] sm:$0xff] %v633_v3 }
 0x13d   :  { %749 = shalt.err (!%p746_p6)
}
 0x13e   :  { %s750_s17 = scalar_lea.hbm %s890_s3, 2048 }
 0x13f   :  { %p751_p7 = scmp.ne.s32.totalorder %s890_s3, %s750_s17  ;;  %p754_p8 = scmp.lt.u32.totalorder %s750_s17, %s890_s3 }
 0x141   :  { %p756_p9 = pnand %p754_p8, %p751_p7 }
 0x143   :  { %759 = shalt.err (!%p756_p9)
}
 0x144   :  { %559 = dma.vmem_to_hbm [thread:$0]  %s554_s13, 2048, %s890_s3, [#allocation4], %s770_s0, %s770_s0, %s771_s9  }
 0x145   :  { %764 = dma.done.wait [#allocation4], 2048  }
 0x146   :  { %765 = vsyncadd [#allocation4], 4294965248 }
 0x147   :  { %563 = vsyncpa [#allocation3], 1 }
 0x148   :  { %564 = vsyncpa [#allocation6], 1 }
 0x149   :  { %565 = vsyncpa [#allocation4], 1 }

// kernel: tpu_custom_call.1
= control target key start
LH: loop header
LB: loop body
LE: loop exit
PB: predicated region body
PF: predicated region fallthrough
CT: control target
= control target key end

     0   :  { %8 = vsyncpa [#allocation3], 0  ;;  %s887_s0 = inlined_call_operand.hbm [shape: bf16[64,128], index: 0, kind: input, shape index: {}]   ;;  %s888_s1 = inlined_call_operand.hbm [shape: bf16[128,512], index: 1, kind: input, shape index: {}]   ;;  %s889_s2 = inlined_call_operand.vmem [shape: f32[1,512], index: 2, kind: input, shape index: {}]   ;;  %s890_s3 = inlined_call_operand.hbm [shape: bf16[64,512], index: 3, kind: output, shape index: {}]  }
   0x1   :  { %9 = vsyncpa [#allocation6], 0 }
   0x2   :  { %10 = vsyncpa [#allocation4], 0  ;;  %s766_s12 = smov [#allocation2]   ;;  %s694_s16 = scalar_lea.hbm %s887_s0, 512 }
   0x3   :  { %s16_s13 = sshll.u32 %s766_s12, 4  ;;  %p695_p0 = scmp.ne.s32.totalorder %s887_s0, %s694_s16  ;;  %s17_s13 = int_to_ptr.vmem [resolvable:$true] %s16_s13 }
   0x4   :  { %p698_p1 = scmp.lt.u32.totalorder %s694_s16, %s887_s0 }
   0x6   :  { %p700_p2 = pnand %p698_p1, %p695_p0 }
   0x8   :  { %703 = shalt.err (!%p700_p2)
}
   0x9   :  { %s704_s21 = scalar_lea.vmem %s17_s13, 512  ;;  %p709_p4 = scmp.lt.s32.totalorder %s17_s13, %s17_s13 }
   0xa   :  { %p705_p3 = scmp.ne.s32.totalorder %s17_s13, %s704_s21  ;;  %p710_p5 = scmp.lt.s32.totalorder %s704_s21, %s704_s21 }
   0xc   :  { %p711_p6 = por %p710_p5, %p709_p4 }
   0xe   :  { %p712_p7 = pnand %p711_p6, %p705_p3 }
  0x10   :  { %715 = shalt.err (!%p712_p7)
}
  0x11   :  { %s767_s22 = smov 64   ;;  %s768_s23 = smov 4  }
  0x12   :  { %22 = dma.hbm_to_vmem [thread:$0]  %s887_s0, 512, %s17_s13, [#allocation3], %s767_s22, %s767_s22, %s768_s23  }
  0x13   :  { %s769_s26 = smov [#allocation5]   ;;  %s716_s30 = scalar_lea.hbm %s888_s1, 4096 }
  0x14   :  { %s28_s27 = sshll.u32 %s769_s26, 4  ;;  %p717_p8 = scmp.ne.s32.totalorder %s888_s1, %s716_s30  ;;  %s29_s27 = int_to_ptr.vmem [resolvable:$true] %s28_s27 }
  0x15   :  { %p720_p9 = scmp.lt.u32.totalorder %s716_s30, %s888_s1 }
  0x17   :  { %p722_p10 = pnand %p720_p9, %p717_p8 }
  0x19   :  { %725 = shalt.err (!%p722_p10)
}
  0x1a   :  { %s726_s8 = scalar_lea.vmem %s29_s27, 4096  ;;  %p731_p12 = scmp.lt.s32.totalorder %s29_s27, %s29_s27 }
  0x1b   :  { %p727_p11 = scmp.ne.s32.totalorder %s29_s27, %s726_s8  ;;  %p732_p13 = scmp.lt.s32.totalorder %s726_s8, %s726_s8 }
  0x1d   :  { %p733_p0 = por %p732_p13, %p731_p12 }
  0x1f   :  { %p734_p1 = pnand %p733_p0, %p727_p11 }
  0x21   :  { %737 = shalt.err (!%p734_p1)
}
  0x22   :  { %s770_s0 = smov 256   ;;  %s771_s9 = smov 16  }
  0x23   :  { %34 = dma.hbm_to_vmem [thread:$0]  %s888_s1, 4096, %s29_s27, [#allocation6], %s770_s0, %s770_s0, %s771_s9  }
  0x24   :  { %760 = dma.done.wait [#allocation3], 512  }
  0x25   :  { %761 = vsyncadd [#allocation3], 4294966784 }
  0x26   :  { %762 = dma.done.wait [#allocation6], 4096  }
  0x27   :  { %763 = vsyncadd [#allocation6], 4294963200  ;;  %v772_v0 = vmov 0   ;;  %v642_v1 = vld [vmem:[#allocation5 + $0x4] ss:$16 sps:$4 sm:$0xff]   ;;  %v691_v34 = vld [vmem:[#allocation2 + $0x8] sm:$0xff]   ;;  %v86_v37 = vlaneseq }
  0x28   :  { %322 = vmatprep.mubr.bf16.mxu0 %v772_v0  ;;  %395 = vmatprep.mubr.bf16.mxu1 %v772_v0  ;;  %v644_v2 = vld [vmem:[#allocation5 + $0xc] ss:$16 sps:$4 sm:$0xff]   ;;  %v646_v3 = vld [vmem:[#allocation5] ss:$16 sps:$4 sm:$0xff]   ;;  %v647_v4 = vld [vmem:[#allocation5 + $0x8] ss:$16 sps:$4 sm:$0xff]  }
  0x29   :  { %290 = vmatprep.subr.bf16.mxu0 %v642_v1  ;;  %363 = vmatprep.subr.bf16.mxu1 %v644_v2  ;;  %v648_v5 = vld [vmem:[#allocation5 + $0x24] ss:$16 sps:$4 sm:$0xff]   ;;  %v650_v6 = vld [vmem:[#allocation5 + $0x2c] ss:$16 sps:$4 sm:$0xff]   ;;  %v652_v7 = vld [vmem:[#allocation5 + $0x20] ss:$16 sps:$4 sm:$0xff]  }
  0x2a   :  { %291 = vmatpush1.bf16.msra.mxu0 %v646_v3  ;;  %364 = vmatpush1.bf16.msra.mxu1 %v647_v4  ;;  %v653_v8 = vld [vmem:[#allocation5 + $0x28] ss:$16 sps:$4 sm:$0xff]   ;;  %v654_v9 = vld [vmem:[#allocation5 + $0x44] ss:$16 sps:$4 sm:$0xff]   ;;  %v656_v10 = vld [vmem:[#allocation5 + $0x4c] ss:$16 sps:$4 sm:$0xff]  }
  0x2b   :  { %292 = vmatprep.subr.bf16.mxu0 %v648_v5  ;;  %365 = vmatprep.subr.bf16.mxu1 %v650_v6  ;;  %v658_v11 = vld [vmem:[#allocation5 + $0x40] ss:$16 sps:$4 sm:$0xff]   ;;  %v659_v12 = vld [vmem:[#allocation5 + $0x48] ss:$16 sps:$4 sm:$0xff]   ;;  %v660_v13 = vld [vmem:[#allocation5 + $0x64] ss:$16 sps:$4 sm:$0xff]  }
  0x2c   :  { %v662_v14 = vld [vmem:[#allocation5 + $0x6c] ss:$16 sps:$4 sm:$0xff]   ;;  %v664_v15 = vld [vmem:[#allocation5 + $0x60] ss:$16 sps:$4 sm:$0xff]   ;;  %v665_v16 = vld [vmem:[#allocation5 + $0x68] ss:$16 sps:$4 sm:$0xff]  }
  0x2d   :  { %v666_v17 = vld [vmem:[#allocation5 + $0x84] ss:$16 sps:$4 sm:$0xff]   ;;  %v668_v18 = vld [vmem:[#allocation5 + $0x8c] ss:$16 sps:$4 sm:$0xff]   ;;  %v670_v19 = vld [vmem:[#allocation5 + $0x80] ss:$16 sps:$4 sm:$0xff]  }
  0x2e   :  { %293 = vmatpush1.bf16.msra.mxu0 %v652_v7  ;;  %366 = vmatpush1.bf16.msra.mxu1 %v653_v8  ;;  %v671_v20 = vld [vmem:[#allocation5 + $0x88] ss:$16 sps:$4 sm:$0xff]   ;;  %v672_v21 = vld [vmem:[#allocation5 + $0xa4] ss:$16 sps:$4 sm:$0xff]   ;;  %v674_v22 = vld [vmem:[#allocation5 + $0xac] ss:$16 sps:$4 sm:$0xff]  }
  0x2f   :  { %294 = vmatprep.subr.bf16.mxu0 %v654_v9  ;;  %367 = vmatprep.subr.bf16.mxu1 %v656_v10  ;;  %v676_v23 = vld [vmem:[#allocation5 + $0xa0] ss:$16 sps:$4 sm:$0xff]   ;;  %v677_v24 = vld [vmem:[#allocation5 + $0xa8] ss:$16 sps:$4 sm:$0xff]   ;;  %v678_v25 = vld [vmem:[#allocation5 + $0xc4] ss:$16 sps:$4 sm:$0xff]  }
  0x30   :  { %v680_v26 = vld [vmem:[#allocation5 + $0xcc] ss:$16 sps:$4 sm:$0xff]   ;;  %v682_v27 = vld [vmem:[#allocation5 + $0xc0] ss:$16 sps:$4 sm:$0xff]   ;;  %v683_v28 = vld [vmem:[#allocation5 + $0xc8] ss:$16 sps:$4 sm:$0xff]  }
  0x31   :  { %v684_v29 = vld [vmem:[#allocation5 + $0xe4] ss:$16 sps:$4 sm:$0xff]   ;;  %v686_v30 = vld [vmem:[#allocation5 + $0xec] ss:$16 sps:$4 sm:$0xff]   ;;  %v688_v31 = vld [vmem:[#allocation5 + $0xe0] ss:$16 sps:$4 sm:$0xff]  }
  0x32   :  { %295 = vmatpush1.bf16.msra.mxu0 %v658_v11  ;;  %368 = vmatpush1.bf16.msra.mxu1 %v659_v12  ;;  %v689_v32 = vld [vmem:[#allocation5 + $0xe8] ss:$16 sps:$4 sm:$0xff]   ;;  %v690_v33 = vld [vmem:[#allocation2] sm:$0xff]   ;;  %v692_v35 = vld [vmem:[#allocation2 + $0x10] sm:$0xff]   ;;  %v87_v38 = vshrl.u32 %v86_v37, 7 }
  0x33   :  { %296 = vmatprep.subr.bf16.mxu0 %v660_v13  ;;  %369 = vmatprep.subr.bf16.mxu1 %v662_v14  ;;  %v693_v36 = vld [vmem:[#allocation2 + $0x18] sm:$0xff]   ;;  %v84_v41 = vld [vmem:[%s889_s2] sm:$0xf]  ;;  %s773_s2 = smov [#allocation7]  }
  0x34   :  { %v88_v39 = vsub.s32 0, %v87_v38  ;;  %v96_v40 = vsub.s32 2, %v87_v38  ;;  %v92_v42 = vsub.s32 1, %v87_v38  ;;  %v100_v43 = vsub.s32 3, %v87_v38  ;;  %s553_s13 = sshll.u32 %s773_s2, 4  ;;  %s554_s13 = int_to_ptr.vmem [resolvable:$true] %s553_s13 }
  0x35   :  { %s738_s14 = scalar_lea.vmem %s554_s13, 2048  ;;  %p743_p3 = scmp.lt.s32.totalorder %s554_s13, %s554_s13 }
  0x36   :  { %297 = vmatpush1.bf16.msra.mxu0 %v664_v15  ;;  %370 = vmatpush1.bf16.msra.mxu1 %v665_v16  ;;  %v832_v44 = vrot.slane %v84_v41, %v88_v39  ;;  %v834_v45 = vrot.slane %v84_v41, %v96_v40  ;;  %v836_v46 = vrot.slane %v84_v41, %v92_v42  ;;  %p739_p2 = scmp.ne.s32.totalorder %s554_s13, %s738_s14  ;;  %p744_p4 = scmp.lt.s32.totalorder %s738_s14, %s738_s14 }
  0x37   :  { %298 = vmatprep.subr.bf16.mxu0 %v666_v17  ;;  %371 = vmatprep.subr.bf16.mxu1 %v668_v18  ;;  %v838_v47 = vrot.slane %v84_v41, %v100_v43 }
  0x38   :  { %p745_p5 = por %p744_p4, %p743_p3 }
  0x3a   :  { %299 = vmatpush1.bf16.msra.mxu0 %v670_v19  ;;  %372 = vmatpush1.bf16.msra.mxu1 %v671_v20  ;;  %p746_p6 = pnand %p745_p5, %p739_p2 }
  0x3b   :  { %300 = vmatprep.subr.bf16.mxu0 %v672_v21  ;;  %373 = vmatprep.subr.bf16.mxu1 %v674_v22 }
  0x3e   :  { %301 = vmatpush1.bf16.msra.mxu0 %v676_v23  ;;  %374 = vmatpush1.bf16.msra.mxu1 %v677_v24 }
  0x3f   :  { %302 = vmatprep.subr.bf16.mxu0 %v678_v25  ;;  %375 = vmatprep.subr.bf16.mxu1 %v680_v26 }
  0x42   :  { %303 = vmatpush1.bf16.msra.mxu0 %v682_v27  ;;  %376 = vmatpush1.bf16.msra.mxu1 %v683_v28 }
  0x43   :  { %304 = vmatprep.subr.bf16.mxu0 %v684_v29  ;;  %377 = vmatprep.subr.bf16.mxu1 %v686_v30 }
  0x46   :  { %305 = vmatpush1.bf16.msra.mxu0 %v688_v31  ;;  %378 = vmatpush1.bf16.msra.mxu1 %v689_v32 }
  0x49   :  { %323 = vmatmul.mubr.bf16.vlgmr.msra.gmra.mrb[0].mxu0 %v690_v33  ;;  %396 = vmatmul.mubr.bf16.vlgmr.msra.gmra.mrb[0].mxu1 %v690_v33 }
  0x4a   :  { %332 = vmatprep.mubr.bf16.mxu0 %v772_v0  ;;  %405 = vmatprep.mubr.bf16.mxu1 %v772_v0 }
  0x51   :  { %333 = vmatmul.mubr.bf16.gmra.mrb[4].mxu0 %v691_v34  ;;  %406 = vmatmul.mubr.bf16.gmra.mrb[4].mxu1 %v691_v34 }
  0x52   :  { %342 = vmatprep.mubr.bf16.mxu0 %v772_v0  ;;  %415 = vmatprep.mubr.bf16.mxu1 %v772_v0 }
  0x59   :  { %343 = vmatmul.mubr.bf16.gmra.mrb[8].mxu0 %v692_v35  ;;  %416 = vmatmul.mubr.bf16.gmra.mrb[8].mxu1 %v692_v35 }
  0x5a   :  { %352 = vmatprep.mubr.bf16.mxu0 %v772_v0  ;;  %425 = vmatprep.mubr.bf16.mxu1 %v772_v0 }
  0x61   :  { %353 = vmatmul.mubr.bf16.gmra.mrb[12].mxu0 %v693_v36  ;;  %426 = vmatmul.mubr.bf16.gmra.mrb[12].mxu1 %v693_v36 }
 0x11c   :  { %v324_v48 = vpop.f32.mrb[0].mxu0  ;;  %v397_v49 = vpop.f32.mrb[0].mxu1 }
 0x11d   :  { %v325_v50 = vadd.f32 %v324_v48, %v832_v44  ;;  %v398_v51 = vadd.f32 %v397_v49, %v834_v45  ;;  %v326_v52 = vpop.f32.mrb[1].mxu0  ;;  %v399_v53 = vpop.f32.mrb[1].mxu1 }
 0x11e   :  { %v327_v54 = vadd.f32 %v326_v52, %v836_v46  ;;  %v400_v55 = vadd.f32 %v399_v53, %v838_v47  ;;  %v328_v56 = vpop.f32.mrb[2].mxu0  ;;  %v401_v57 = vpop.f32.mrb[2].mxu1 }
 0x11f   :  { %v329_v58 = vadd.f32 %v328_v56, %v832_v44  ;;  %v402_v59 = vadd.f32 %v401_v57, %v834_v45  ;;  %v330_v60 = vpop.f32.mrb[3].mxu0  ;;  %v403_v61 = vpop.f32.mrb[3].mxu1 }
 0x120   :  { %v618_v62 = vpack.c.bf16 %v327_v54, %v325_v50  ;;  %v619_v63 = vpack.c.bf16 %v400_v55, %v398_v51  ;;  %v331_v0 = vadd.f32 %v330_v60, %v836_v46  ;;  %v404_v1 = vadd.f32 %v403_v61, %v838_v47 }
 0x122   :  { %532 = vst [vmem:[#allocation7] sm:$0xff] %v618_v62  ;;  %533 = vst [vmem:[#allocation7 + $0x8] sm:$0xff] %v619_v63  ;;  %v620_v2 = vpack.c.bf16 %v331_v0, %v329_v58  ;;  %v621_v3 = vpack.c.bf16 %v404_v1, %v402_v59 }
 0x124   :  { %534 = vst [vmem:[#allocation7 + $0x10] sm:$0xff] %v620_v2  ;;  %535 = vst [vmem:[#allocation7 + $0x18] sm:$0xff] %v621_v3  ;;  %v334_v4 = vpop.f32.mrb[4].mxu0  ;;  %v407_v5 = vpop.f32.mrb[4].mxu1 }
 0x125   :  { %v335_v6 = vadd.f32 %v334_v4, %v832_v44  ;;  %v408_v7 = vadd.f32 %v407_v5, %v834_v45  ;;  %v336_v8 = vpop.f32.mrb[5].mxu0  ;;  %v409_v9 = vpop.f32.mrb[5].mxu1 }
 0x126   :  { %v337_v10 = vadd.f32 %v336_v8, %v836_v46  ;;  %v410_v11 = vadd.f32 %v409_v9, %v838_v47  ;;  %v338_v12 = vpop.f32.mrb[6].mxu0  ;;  %v411_v13 = vpop.f32.mrb[6].mxu1 }
 0x127   :  { %v339_v14 = vadd.f32 %v338_v12, %v832_v44  ;;  %v412_v15 = vadd.f32 %v411_v13, %v834_v45  ;;  %v340_v16 = vpop.f32.mrb[7].mxu0  ;;  %v413_v17 = vpop.f32.mrb[7].mxu1 }
 0x128   :  { %v622_v18 = vpack.c.bf16 %v337_v10, %v335_v6  ;;  %v623_v19 = vpack.c.bf16 %v410_v11, %v408_v7  ;;  %v341_v20 = vadd.f32 %v340_v16, %v836_v46  ;;  %v414_v21 = vadd.f32 %v413_v17, %v838_v47 }
 0x12a   :  { %536 = vst [vmem:[#allocation7 + $0x20] sm:$0xff] %v622_v18  ;;  %537 = vst [vmem:[#allocation7 + $0x28] sm:$0xff] %v623_v19  ;;  %v624_v22 = vpack.c.bf16 %v341_v20, %v339_v14  ;;  %v625_v23 = vpack.c.bf16 %v414_v21, %v412_v15 }
 0x12c   :  { %538 = vst [vmem:[#allocation7 + $0x30] sm:$0xff] %v624_v22  ;;  %539 = vst [vmem:[#allocation7 + $0x38] sm:$0xff] %v625_v23  ;;  %v344_v24 = vpop.f32.mrb[8].mxu0  ;;  %v417_v25 = vpop.f32.mrb[8].mxu1 }
 0x12d   :  { %v345_v26 = vadd.f32 %v344_v24, %v832_v44  ;;  %v418_v27 = vadd.f32 %v417_v25, %v834_v45  ;;  %v346_v28 = vpop.f32.mrb[9].mxu0  ;;  %v419_v29 = vpop.f32.mrb[9].mxu1 }
 0x12e   :  { %v347_v30 = vadd.f32 %v346_v28, %v836_v46  ;;  %v420_v31 = vadd.f32 %v419_v29, %v838_v47  ;;  %v348_v32 = vpop.f32.mrb[10].mxu0  ;;  %v421_v33 = vpop.f32.mrb[10].mxu1 }
 0x12f   :  { %v349_v34 = vadd.f32 %v348_v32, %v832_v44  ;;  %v422_v35 = vadd.f32 %v421_v33, %v834_v45  ;;  %v350_v36 = vpop.f32.mrb[11].mxu0  ;;  %v423_v37 = vpop.f32.mrb[11].mxu1 }
 0x130   :  { %v626_v38 = vpack.c.bf16 %v347_v30, %v345_v26  ;;  %v627_v39 = vpack.c.bf16 %v420_v31, %v418_v27  ;;  %v351_v40 = vadd.f32 %v350_v36, %v836_v46  ;;  %v424_v41 = vadd.f32 %v423_v37, %v838_v47 }
 0x132   :  { %540 = vst [vmem:[#allocation7 + $0x40] sm:$0xff] %v626_v38  ;;  %541 = vst [vmem:[#allocation7 + $0x48] sm:$0xff] %v627_v39  ;;  %v628_v42 = vpack.c.bf16 %v351_v40, %v349_v34  ;;  %v629_v43 = vpack.c.bf16 %v424_v41, %v422_v35 }
 0x134   :  { %542 = vst [vmem:[#allocation7 + $0x50] sm:$0xff] %v628_v42  ;;  %543 = vst [vmem:[#allocation7 + $0x58] sm:$0xff] %v629_v43  ;;  %v354_v48 = vpop.f32.mrb[12].mxu0  ;;  %v427_v49 = vpop.f32.mrb[12].mxu1 }
 0x135   :  { %v355_v50 = vadd.f32 %v354_v48, %v832_v44  ;;  %v428_v51 = vadd.f32 %v427_v49, %v834_v45  ;;  %v356_v52 = vpop.f32.mrb[13].mxu0  ;;  %v429_v53 = vpop.f32.mrb[13].mxu1 }
 0x136   :  { %v357_v54 = vadd.f32 %v356_v52, %v836_v46  ;;  %v430_v55 = vadd.f32 %v429_v53, %v838_v47  ;;  %v358_v56 = vpop.f32.mrb[14].mxu0  ;;  %v431_v57 = vpop.f32.mrb[14].mxu1 }
 0x137   :  { %v359_v58 = vadd.f32 %v358_v56, %v832_v44  ;;  %v432_v59 = vadd.f32 %v431_v57, %v834_v45  ;;  %v360_v60 = vpop.f32.mrb[15].mxu0  ;;  %v433_v61 = vpop.f32.mrb[15].mxu1 }
 0x138   :  { %v630_v62 = vpack.c.bf16 %v357_v54, %v355_v50  ;;  %v631_v63 = vpack.c.bf16 %v430_v55, %v428_v51  ;;  %v361_v0 = vadd.f32 %v360_v60, %v836_v46  ;;  %v434_v1 = vadd.f32 %v433_v61, %v838_v47 }
 0x13a   :  { %544 = vst [vmem:[#allocation7 + $0x60] sm:$0xff] %v630_v62  ;;  %545 = vst [vmem:[#allocation7 + $0x68] sm:$0xff] %v631_v63  ;;  %v632_v2 = vpack.c.bf16 %v361_v0, %v359_v58  ;;  %v633_v3 = vpack.c.bf16 %v434_v1, %v432_v59 }
 0x13c   :  { %546 = vst [vmem:[#allocation7 + $0x70] sm:$0xff] %v632_v2  ;;  %547 = vst [vmem:[#allocation7 + $0x78] sm:$0xff] %v633_v3 }
 0x13d   :  { %749 = shalt.err (!%p746_p6)
}
 0x13e   :  { %s750_s17 = scalar_lea.hbm %s890_s3, 2048 }
 0x13f   :  { %p751_p7 = scmp.ne.s32.totalorder %s890_s3, %s750_s17  ;;  %p754_p8 = scmp.lt.u32.totalorder %s750_s17, %s890_s3 }
 0x141   :  { %p756_p9 = pnand %p754_p8, %p751_p7 }
 0x143   :  { %759 = shalt.err (!%p756_p9)
}
 0x144   :  { %559 = dma.vmem_to_hbm [thread:$0]  %s554_s13, 2048, %s890_s3, [#allocation4], %s770_s0, %s770_s0, %s771_s9  }
 0x145   :  { %764 = dma.done.wait [#allocation4], 2048  }
 0x146   :  { %765 = vsyncadd [#allocation4], 4294965248 }
 0x147   :  { %563 = vsyncpa [#allocation3], 1 }
 0x148   :  { %564 = vsyncpa [#allocation6], 1 }
 0x149   :  { %565 = vsyncpa [#allocation4], 1 }

</bundles_post_ra>
